<compile_context>
chip_gen: v7x
topology: tpu7x:2x2x1
jax: 0.10.0
libtpu: 0.0.40
codegen_flags: <defaults>
</compile_context>

<pallas_src>
import jax
import jax.numpy as jnp
from jax.experimental import pallas as pl
from jax.experimental.pallas import tpu as pltpu


def _round_up(x, m):
    return (x + m - 1) // m * m


def _hard_swish(x):
    # relu6(x + 3) / 6 * x
    return jnp.clip(x + 3.0, 0.0, 6.0) * (1.0 / 6.0) * x


def critic_kernel(s_ref, a_ref,
                  w0s_ref, w0a_ref, b0_ref,
                  w1_ref, b1_ref,
                  w2a_ref, w2b_ref, b2_ref,
                  w3a_ref, w3b_ref, w3c_ref, b3_ref,
                  out_ref):
    s = s_ref[...]
    a = a_ref[...]

    # dense0 on cat(s, a):  x0 @ W0 == s @ W0[:sd] + a @ W0[sd:]
    z0 = (jnp.dot(s, w0s_ref[...], preferred_element_type=jnp.float32)
          + jnp.dot(a, w0a_ref[...], preferred_element_type=jnp.float32)
          + b0_ref[...])
    x1 = _hard_swish(z0)

    # dense1
    z1 = jnp.dot(x1, w1_ref[...], preferred_element_type=jnp.float32) + b1_ref[...]
    h1 = _hard_swish(z1)

    # dense2 on cat(x1, h1):  x2 @ W2 == x1 @ W2[:mod] + h1 @ W2[mod:]
    z2 = (jnp.dot(x1, w2a_ref[...], preferred_element_type=jnp.float32)
          + jnp.dot(h1, w2b_ref[...], preferred_element_type=jnp.float32)
          + b2_ref[...])
    h2 = _hard_swish(z2)

    # dropout: identity in eval mode.
    # dense3 on cat(x1, h1, h2) with N=1 -> VPU multiply + lane reduction
    # (w3 chunks passed as (1, K) row vectors; b3 is a scalar in SMEM).
    x4 = (jnp.sum(x1 * w3a_ref[...], axis=-1, keepdims=True)
          + jnp.sum(h1 * w3b_ref[...], axis=-1, keepdims=True)
          + jnp.sum(h2 * w3c_ref[...], axis=-1, keepdims=True)
          + b3_ref[0])

    out_ref[...] = x4.astype(out_ref.dtype)


def critic_forward(s, a, params, tile_b=512):
    """s: (B, state_dim), a: (B, action_dim).
    params: dict of W*/b* already transposed to (in, out) / (1, out)."""
    B, state_dim = s.shape
    action_dim = a.shape[1]
    mod = params["w1"].shape[0]
    inp_dim = state_dim + action_dim

    # Pre-split weights so the kernel never concatenates along the lane axis.
    w0 = params["w0"]
    w0s, w0a = w0[:state_dim], w0[state_dim:]
    b0 = params["b0"]
    w1, b1 = params["w1"], params["b1"]
    w2 = params["w2"]
    w2a, w2b = w2[:mod], w2[mod:]
    b2 = params["b2"]
    w3 = params["w3"]                                  # (4*mod, 1)
    w3a = w3[:mod, :].reshape(1, mod)
    w3b = w3[mod:2 * mod, :].reshape(1, mod)
    w3c = w3[2 * mod:, :].reshape(1, 2 * mod)
    b3 = params["b3"].reshape(-1).astype(jnp.float32)  # (1,) scalar -> SMEM

    # Batch tiling (pad remainder with zero rows; sliced off at the end).
    tile_b = min(tile_b, _round_up(B, 8))
    B_pad = _round_up(B, tile_b)
    if B_pad != B:
        pad = B_pad - B
        s = jnp.pad(s, ((0, pad), (0, 0)))
        a = jnp.pad(a, ((0, pad), (0, 0)))
    num_tiles = B_pad // tile_b

    tiled = lambda feat: pl.BlockSpec((tile_b, feat), lambda i: (i, 0))
    resident = lambda arr: pl.BlockSpec(arr.shape, lambda i: (0, 0))

    flops = 2 * B_pad * (inp_dim * mod + mod * mod
                         + (2 * mod) * (2 * mod) + 4 * mod)
    weight_bytes = sum(int(p.size) * 4 for p in params.values())
    bytes_accessed = 4 * B_pad * (inp_dim + 1) + weight_bytes

    out = pl.pallas_call(
        critic_kernel,
        out_shape=jax.ShapeDtypeStruct((B_pad, 1), jnp.float32),
        grid=(num_tiles,),
        in_specs=[
            tiled(state_dim), tiled(action_dim),
            resident(w0s), resident(w0a), resident(b0),
            resident(w1), resident(b1),
            resident(w2a), resident(w2b), resident(b2),
            resident(w3a), resident(w3b), resident(w3c),
            pl.BlockSpec(memory_space=pltpu.MemorySpace.SMEM),
        ],
        out_specs=pl.BlockSpec((tile_b, 1), lambda i: (i, 0)),
        compiler_params=pltpu.CompilerParams(
            dimension_semantics=("parallel",)),
        cost_estimate=pl.CostEstimate(
            flops=flops, transcendentals=0, bytes_accessed=bytes_accessed),
    )(s, a, w0s, w0a, b0, w1, b1, w2a, w2b, b2, w3a, w3b, w3c, b3)

    return out[:B]


def init_params(key, state_dim, action_dim, mod_dim):
    """Deterministic init mirroring nn.Linear shapes.
    PyTorch Linear stores W as (out, in); we store the transpose (in, out)."""
    inp_dim = state_dim + action_dim
    out_dim = 1
    dims = [
        (inp_dim, mod_dim * 1),      # dense0
        (mod_dim * 1, mod_dim),      # dense1
        (mod_dim * 2, mod_dim * 2),  # dense2
        (mod_dim * 4, out_dim),      # dense3
    ]
    params = {}
    for i, (din, dout) in enumerate(dims):
        key, kw, kb = jax.random.split(key, 3)
        bound = 1.0 / jnp.sqrt(jnp.float32(din))
        params[f"w{i}"] = jax.random.uniform(
            kw, (din, dout), jnp.float32, minval=-bound, maxval=bound)
        params[f"b{i}"] = jax.random.uniform(
            kb, (1, dout), jnp.float32, minval=-bound, maxval=bound)
    return params


def critic_ref(s, a, params):
    """Pure-JAX reference for sanity check."""
    hs = lambda x: jnp.clip(x + 3.0, 0.0, 6.0) / 6.0 * x
    x0 = jnp.concatenate([s, a], axis=1)
    x1 = hs(x0 @ params["w0"] + params["b0"])
    x2 = jnp.concatenate([x1, hs(x1 @ params["w1"] + params["b1"])], axis=1)
    x3 = jnp.concatenate([x2, hs(x2 @ params["w2"] + params["b2"])], axis=1)
    return x3 @ params["w3"] + params["b3"]


if __name__ == "__main__":
    state_dim, action_dim, mod_dim = 16, 8, 32

    key = jax.random.PRNGKey(0)
    key, ks, ka, kp = jax.random.split(key, 4)
    params = init_params(kp, state_dim, action_dim, mod_dim)

    # Small, tile-aligned batch.
    B = 8
    s = jax.random.normal(ks, (B, state_dim), jnp.float32)
    a = jax.random.normal(ka, (B, action_dim), jnp.float32)
    out = jax.block_until_ready(critic_forward(s, a, params))
    ref = critic_ref(s, a, params)
    assert out.shape == (B, 1), out.shape
    assert jnp.allclose(out, ref, atol=1e-4, rtol=1e-4), (out, ref)

    # Non-multiple batch: exercises the pad + slice remainder path.
    key, ks2, ka2 = jax.random.split(key, 3)
    B2 = 20
    s2 = jax.random.normal(ks2, (B2, state_dim), jnp.float32)
    a2 = jax.random.normal(ka2, (B2, action_dim), jnp.float32)
    out2 = jax.block_until_ready(critic_forward(s2, a2, params))
    ref2 = critic_ref(s2, a2, params)
    assert out2.shape == (B2, 1), out2.shape
    assert jnp.allclose(out2, ref2, atol=1e-4, rtol=1e-4), (out2, ref2)

    print("KERNEL_OK")
</pallas_src>

<mosaic_0001>
module attributes {stable_mosaic.version = 11 : i64} {
  func.func @critic_kernel(%arg0: i32, %arg1: memref<8x16xf32, #tpu.memory_space<vmem>>, %arg2: memref<8x8xf32, #tpu.memory_space<vmem>>, %arg3: memref<16x32xf32, #tpu.memory_space<vmem>>, %arg4: memref<8x32xf32, #tpu.memory_space<vmem>>, %arg5: memref<1x32xf32, #tpu.memory_space<vmem>>, %arg6: memref<32x32xf32, #tpu.memory_space<vmem>>, %arg7: memref<1x32xf32, #tpu.memory_space<vmem>>, %arg8: memref<32x64xf32, #tpu.memory_space<vmem>>, %arg9: memref<32x64xf32, #tpu.memory_space<vmem>>, %arg10: memref<1x64xf32, #tpu.memory_space<vmem>>, %arg11: memref<1x32xf32, #tpu.memory_space<vmem>>, %arg12: memref<1x32xf32, #tpu.memory_space<vmem>>, %arg13: memref<1x64xf32, #tpu.memory_space<vmem>>, %arg14: memref<1xf32, #tpu.memory_space<smem>>, %arg15: memref<8x1xf32, #tpu.memory_space<vmem>>) attributes {dimension_semantics = [#tpu.dimension_semantics<parallel>], iteration_bounds = array<i64: 1>, scalar_prefetch = 0 : i64, scratch_operands = 0 : i64, tpu.core_type = #tpu.core_type<tc>, window_params = [{transform_indices = @transform_0, window_bounds = array<i64: 8, 16>}, {transform_indices = @transform_1, window_bounds = array<i64: 8, 8>}, {pipeline_mode = #tpu.pipeline_mode<synchronous>, transform_indices = @transform_2, window_bounds = array<i64: 16, 32>}, {pipeline_mode = #tpu.pipeline_mode<synchronous>, transform_indices = @transform_3, window_bounds = array<i64: 8, 32>}, {pipeline_mode = #tpu.pipeline_mode<synchronous>, transform_indices = @transform_4, window_bounds = array<i64: 1, 32>}, {pipeline_mode = #tpu.pipeline_mode<synchronous>, transform_indices = @transform_5, window_bounds = array<i64: 32, 32>}, {pipeline_mode = #tpu.pipeline_mode<synchronous>, transform_indices = @transform_6, window_bounds = array<i64: 1, 32>}, {pipeline_mode = #tpu.pipeline_mode<synchronous>, transform_indices = @transform_7, window_bounds = array<i64: 32, 64>}, {pipeline_mode = #tpu.pipeline_mode<synchronous>, transform_indices = @transform_8, window_bounds = array<i64: 32, 64>}, {pipeline_mode = #tpu.pipeline_mode<synchronous>, transform_indices = @transform_9, window_bounds = array<i64: 1, 64>}, {pipeline_mode = #tpu.pipeline_mode<synchronous>, transform_indices = @transform_10, window_bounds = array<i64: 1, 32>}, {pipeline_mode = #tpu.pipeline_mode<synchronous>, transform_indices = @transform_11, window_bounds = array<i64: 1, 32>}, {pipeline_mode = #tpu.pipeline_mode<synchronous>, transform_indices = @transform_12, window_bounds = array<i64: 1, 64>}, {transform_indices = @transform_13, window_bounds = array<i64: 1>}, {transform_indices = @transform_14, window_bounds = array<i64: 8, 1>}]} {
    %c0 = arith.constant 0 : index
    %c0_0 = arith.constant 0 : index
    %0 = vector.load %arg1[%c0, %c0_0] : memref<8x16xf32, #tpu.memory_space<vmem>>, vector<8x16xf32>
    %c0_1 = arith.constant 0 : index
    %c0_2 = arith.constant 0 : index
    %1 = vector.load %arg2[%c0_1, %c0_2] : memref<8x8xf32, #tpu.memory_space<vmem>>, vector<8x8xf32>
    %c0_3 = arith.constant 0 : index
    %c0_4 = arith.constant 0 : index
    %2 = vector.load %arg3[%c0_3, %c0_4] : memref<16x32xf32, #tpu.memory_space<vmem>>, vector<16x32xf32>
    %cst = arith.constant dense<0.000000e+00> : vector<8x32xf32>
    %3 = tpu.matmul %0, %2, %cst {dimension_numbers = #tpu.dot_dimension_numbers<[1], [0], [0], [1], [0, 0, 1, 1], [], []>} : vector<8x16xf32>, vector<16x32xf32>, vector<8x32xf32> -> vector<8x32xf32>
    %c0_5 = arith.constant 0 : index
    %c0_6 = arith.constant 0 : index
    %4 = vector.load %arg4[%c0_5, %c0_6] : memref<8x32xf32, #tpu.memory_space<vmem>>, vector<8x32xf32>
    %cst_7 = arith.constant dense<0.000000e+00> : vector<8x32xf32>
    %5 = tpu.matmul %1, %4, %cst_7 {dimension_numbers = #tpu.dot_dimension_numbers<[1], [0], [0], [1], [0, 0, 1, 1], [], []>} : vector<8x8xf32>, vector<8x32xf32>, vector<8x32xf32> -> vector<8x32xf32>
    %6 = arith.addf %3, %5 : vector<8x32xf32>
    %c0_8 = arith.constant 0 : index
    %c0_9 = arith.constant 0 : index
    %7 = vector.load %arg5[%c0_8, %c0_9] : memref<1x32xf32, #tpu.memory_space<vmem>>, vector<1x32xf32>
    %8 = vector.broadcast %7 : vector<1x32xf32> to vector<8x32xf32>
    %9 = arith.addf %6, %8 : vector<8x32xf32>
    %cst_10 = arith.constant 3.000000e+00 : f32
    %10 = vector.broadcast %cst_10 : f32 to vector<8x32xf32>
    %11 = arith.addf %9, %10 : vector<8x32xf32>
    %cst_11 = arith.constant 0.000000e+00 : f32
    %cst_12 = arith.constant 6.000000e+00 : f32
    %12 = vector.broadcast %cst_11 : f32 to vector<8x32xf32>
    %13 = arith.maximumf %12, %11 : vector<8x32xf32>
    %14 = vector.broadcast %cst_12 : f32 to vector<8x32xf32>
    %15 = arith.minimumf %14, %13 : vector<8x32xf32>
    %cst_13 = arith.constant 0.166666672 : f32
    %16 = vector.broadcast %cst_13 : f32 to vector<8x32xf32>
    %17 = arith.mulf %15, %16 : vector<8x32xf32>
    %18 = arith.mulf %17, %9 : vector<8x32xf32>
    %c0_14 = arith.constant 0 : index
    %c0_15 = arith.constant 0 : index
    %19 = vector.load %arg6[%c0_14, %c0_15] : memref<32x32xf32, #tpu.memory_space<vmem>>, vector<32x32xf32>
    %cst_16 = arith.constant dense<0.000000e+00> : vector<8x32xf32>
    %20 = tpu.matmul %18, %19, %cst_16 {dimension_numbers = #tpu.dot_dimension_numbers<[1], [0], [0], [1], [0, 0, 1, 1], [], []>} : vector<8x32xf32>, vector<32x32xf32>, vector<8x32xf32> -> vector<8x32xf32>
    %c0_17 = arith.constant 0 : index
    %c0_18 = arith.constant 0 : index
    %21 = vector.load %arg7[%c0_17, %c0_18] : memref<1x32xf32, #tpu.memory_space<vmem>>, vector<1x32xf32>
    %22 = vector.broadcast %21 : vector<1x32xf32> to vector<8x32xf32>
    %23 = arith.addf %20, %22 : vector<8x32xf32>
    %cst_19 = arith.constant 3.000000e+00 : f32
    %24 = vector.broadcast %cst_19 : f32 to vector<8x32xf32>
    %25 = arith.addf %23, %24 : vector<8x32xf32>
    %cst_20 = arith.constant 0.000000e+00 : f32
    %cst_21 = arith.constant 6.000000e+00 : f32
    %26 = vector.broadcast %cst_20 : f32 to vector<8x32xf32>
    %27 = arith.maximumf %26, %25 : vector<8x32xf32>
    %28 = vector.broadcast %cst_21 : f32 to vector<8x32xf32>
    %29 = arith.minimumf %28, %27 : vector<8x32xf32>
    %cst_22 = arith.constant 0.166666672 : f32
    %30 = vector.broadcast %cst_22 : f32 to vector<8x32xf32>
    %31 = arith.mulf %29, %30 : vector<8x32xf32>
    %32 = arith.mulf %31, %23 : vector<8x32xf32>
    %c0_23 = arith.constant 0 : index
    %c0_24 = arith.constant 0 : index
    %33 = vector.load %arg8[%c0_23, %c0_24] : memref<32x64xf32, #tpu.memory_space<vmem>>, vector<32x64xf32>
    %cst_25 = arith.constant dense<0.000000e+00> : vector<8x64xf32>
    %34 = tpu.matmul %18, %33, %cst_25 {dimension_numbers = #tpu.dot_dimension_numbers<[1], [0], [0], [1], [0, 0, 1, 1], [], []>} : vector<8x32xf32>, vector<32x64xf32>, vector<8x64xf32> -> vector<8x64xf32>
    %c0_26 = arith.constant 0 : index
    %c0_27 = arith.constant 0 : index
    %35 = vector.load %arg9[%c0_26, %c0_27] : memref<32x64xf32, #tpu.memory_space<vmem>>, vector<32x64xf32>
    %cst_28 = arith.constant dense<0.000000e+00> : vector<8x64xf32>
    %36 = tpu.matmul %32, %35, %cst_28 {dimension_numbers = #tpu.dot_dimension_numbers<[1], [0], [0], [1], [0, 0, 1, 1], [], []>} : vector<8x32xf32>, vector<32x64xf32>, vector<8x64xf32> -> vector<8x64xf32>
    %37 = arith.addf %34, %36 : vector<8x64xf32>
    %c0_29 = arith.constant 0 : index
    %c0_30 = arith.constant 0 : index
    %38 = vector.load %arg10[%c0_29, %c0_30] : memref<1x64xf32, #tpu.memory_space<vmem>>, vector<1x64xf32>
    %39 = vector.broadcast %38 : vector<1x64xf32> to vector<8x64xf32>
    %40 = arith.addf %37, %39 : vector<8x64xf32>
    %cst_31 = arith.constant 3.000000e+00 : f32
    %41 = vector.broadcast %cst_31 : f32 to vector<8x64xf32>
    %42 = arith.addf %40, %41 : vector<8x64xf32>
    %cst_32 = arith.constant 0.000000e+00 : f32
    %cst_33 = arith.constant 6.000000e+00 : f32
    %43 = vector.broadcast %cst_32 : f32 to vector<8x64xf32>
    %44 = arith.maximumf %43, %42 : vector<8x64xf32>
    %45 = vector.broadcast %cst_33 : f32 to vector<8x64xf32>
    %46 = arith.minimumf %45, %44 : vector<8x64xf32>
    %cst_34 = arith.constant 0.166666672 : f32
    %47 = vector.broadcast %cst_34 : f32 to vector<8x64xf32>
    %48 = arith.mulf %46, %47 : vector<8x64xf32>
    %49 = arith.mulf %48, %40 : vector<8x64xf32>
    %c0_35 = arith.constant 0 : index
    %c0_36 = arith.constant 0 : index
    %50 = vector.load %arg11[%c0_35, %c0_36] : memref<1x32xf32, #tpu.memory_space<vmem>>, vector<1x32xf32>
    %51 = vector.broadcast %50 : vector<1x32xf32> to vector<8x32xf32>
    %52 = arith.mulf %18, %51 : vector<8x32xf32>
    %cst_37 = arith.constant dense<0.000000e+00> : vector<8xf32>
    %53 = vector.multi_reduction <add>, %52, %cst_37 [1] : vector<8x32xf32> to vector<8xf32>
    %54 = vector.shape_cast %53 : vector<8xf32> to vector<8x1xf32>
    %c0_38 = arith.constant 0 : index
    %c0_39 = arith.constant 0 : index
    %55 = vector.load %arg12[%c0_38, %c0_39] : memref<1x32xf32, #tpu.memory_space<vmem>>, vector<1x32xf32>
    %56 = vector.broadcast %55 : vector<1x32xf32> to vector<8x32xf32>
    %57 = arith.mulf %32, %56 : vector<8x32xf32>
    %cst_40 = arith.constant dense<0.000000e+00> : vector<8xf32>
    %58 = vector.multi_reduction <add>, %57, %cst_40 [1] : vector<8x32xf32> to vector<8xf32>
    %59 = vector.shape_cast %58 : vector<8xf32> to vector<8x1xf32>
    %60 = arith.addf %54, %59 : vector<8x1xf32>
    %c0_41 = arith.constant 0 : index
    %c0_42 = arith.constant 0 : index
    %61 = vector.load %arg13[%c0_41, %c0_42] : memref<1x64xf32, #tpu.memory_space<vmem>>, vector<1x64xf32>
    %62 = vector.broadcast %61 : vector<1x64xf32> to vector<8x64xf32>
    %63 = arith.mulf %49, %62 : vector<8x64xf32>
    %cst_43 = arith.constant dense<0.000000e+00> : vector<8xf32>
    %64 = vector.multi_reduction <add>, %63, %cst_43 [1] : vector<8x64xf32> to vector<8xf32>
    %65 = vector.shape_cast %64 : vector<8xf32> to vector<8x1xf32>
    %66 = arith.addf %60, %65 : vector<8x1xf32>
    %c0_44 = arith.constant 0 : index
    %67 = memref.load %arg14[%c0_44] : memref<1xf32, #tpu.memory_space<smem>>
    %68 = vector.broadcast %67 : f32 to vector<8x1xf32>
    %69 = arith.addf %66, %68 : vector<8x1xf32>
    %c0_45 = arith.constant 0 : index
    %c0_46 = arith.constant 0 : index
    %70 = vector.load %arg15[%c0_45, %c0_46] : memref<8x1xf32, #tpu.memory_space<vmem>>, vector<8x1xf32>
    tpu.vector_store %arg15[%c0_45, %c0_46], %69 {strides = array<i32>} : memref<8x1xf32, #tpu.memory_space<vmem>>, vector<8x1xf32>,
    return
  }
  func.func @transform_0(%arg0: i32) -> (i32, i32) {
    %c0_i32 = arith.constant 0 : i32
    %c0_i32_0 = arith.constant 0 : i32
    return %arg0, %c0_i32 : i32, i32
  }
  func.func @transform_1(%arg0: i32) -> (i32, i32) {
    %c0_i32 = arith.constant 0 : i32
    %c0_i32_0 = arith.constant 0 : i32
    return %arg0, %c0_i32 : i32, i32
  }
  func.func @transform_2(%arg0: i32) -> (i32, i32) {
    %c0_i32 = arith.constant 0 : i32
    %c0_i32_0 = arith.constant 0 : i32
    %c0_i32_1 = arith.constant 0 : i32
    return %c0_i32, %c0_i32_0 : i32, i32
  }
  func.func @transform_3(%arg0: i32) -> (i32, i32) {
    %c0_i32 = arith.constant 0 : i32
    %c0_i32_0 = arith.constant 0 : i32
    %c0_i32_1 = arith.constant 0 : i32
    return %c0_i32, %c0_i32_0 : i32, i32
  }
  func.func @transform_4(%arg0: i32) -> (i32, i32) {
    %c0_i32 = arith.constant 0 : i32
    %c0_i32_0 = arith.constant 0 : i32
    %c0_i32_1 = arith.constant 0 : i32
    return %c0_i32, %c0_i32_0 : i32, i32
  }
  func.func @transform_5(%arg0: i32) -> (i32, i32) {
    %c0_i32 = arith.constant 0 : i32
    %c0_i32_0 = arith.constant 0 : i32
    %c0_i32_1 = arith.constant 0 : i32
    return %c0_i32, %c0_i32_0 : i32, i32
  }
  func.func @transform_6(%arg0: i32) -> (i32, i32) {
    %c0_i32 = arith.constant 0 : i32
    %c0_i32_0 = arith.constant 0 : i32
    %c0_i32_1 = arith.constant 0 : i32
    return %c0_i32, %c0_i32_0 : i32, i32
  }
  func.func @transform_7(%arg0: i32) -> (i32, i32) {
    %c0_i32 = arith.constant 0 : i32
    %c0_i32_0 = arith.constant 0 : i32
    %c0_i32_1 = arith.constant 0 : i32
    return %c0_i32, %c0_i32_0 : i32, i32
  }
  func.func @transform_8(%arg0: i32) -> (i32, i32) {
    %c0_i32 = arith.constant 0 : i32
    %c0_i32_0 = arith.constant 0 : i32
    %c0_i32_1 = arith.constant 0 : i32
    return %c0_i32, %c0_i32_0 : i32, i32
  }
  func.func @transform_9(%arg0: i32) -> (i32, i32) {
    %c0_i32 = arith.constant 0 : i32
    %c0_i32_0 = arith.constant 0 : i32
    %c0_i32_1 = arith.constant 0 : i32
    return %c0_i32, %c0_i32_0 : i32, i32
  }
  func.func @transform_10(%arg0: i32) -> (i32, i32) {
    %c0_i32 = arith.constant 0 : i32
    %c0_i32_0 = arith.constant 0 : i32
    %c0_i32_1 = arith.constant 0 : i32
    return %c0_i32, %c0_i32_0 : i32, i32
  }
  func.func @transform_11(%arg0: i32) -> (i32, i32) {
    %c0_i32 = arith.constant 0 : i32
    %c0_i32_0 = arith.constant 0 : i32
    %c0_i32_1 = arith.constant 0 : i32
    return %c0_i32, %c0_i32_0 : i32, i32
  }
  func.func @transform_12(%arg0: i32) -> (i32, i32) {
    %c0_i32 = arith.constant 0 : i32
    %c0_i32_0 = arith.constant 0 : i32
    %c0_i32_1 = arith.constant 0 : i32
    return %c0_i32, %c0_i32_0 : i32, i32
  }
  func.func @transform_13(%arg0: i32) -> i32 {
    %c0_i32 = arith.constant 0 : i32
    %c0_i32_0 = arith.constant 0 : i32
    return %c0_i32 : i32
  }
  func.func @transform_14(%arg0: i32) -> (i32, i32) {
    %c0_i32 = arith.constant 0 : i32
    %c0_i32_0 = arith.constant 0 : i32
    return %arg0, %c0_i32 : i32, i32
  }
}

</mosaic_0001>

<bundles_post_ra>
// kernel: tpu_custom_call.1
= control target key start
LH: loop header
LB: loop body
LE: loop exit
PB: predicated region body
PF: predicated region fallthrough
CT: control target
= control target key end

     0   :  { %20 = vsyncpa [#allocation4], 0  ;;  %s1068_s0 = inlined_call_operand.hbm [shape: f32[8,16], index: 0, kind: input, shape index: {}]   ;;  %s1069_s1 = inlined_call_operand.hbm [shape: f32[8,8], index: 1, kind: input, shape index: {}]   ;;  %s1070_s2 = inlined_call_operand.hbm [shape: f32[16,32], index: 2, kind: input, shape index: {}]   ;;  %s1071_s3 = inlined_call_operand.hbm [shape: f32[8,32], index: 3, kind: input, shape index: {}]   ;;  %s1072_s4 = inlined_call_operand.vmem [shape: f32[1,32], index: 4, kind: input, shape index: {}]   ;;  %s1073_s5 = inlined_call_operand.hbm [shape: f32[32,32], index: 5, kind: input, shape index: {}]   ;;  %s1074_s6 = inlined_call_operand.vmem [shape: f32[1,32], index: 6, kind: input, shape index: {}]   ;;  %s1075_s7 = inlined_call_operand.hbm [shape: f32[32,64], index: 7, kind: input, shape index: {}]   ;;  %s1076_s8 = inlined_call_operand.vmem [shape: f32[32,64], index: 8, kind: input, shape index: {}]   ;;  %s1077_s9 = inlined_call_operand.vmem [shape: f32[1,64], index: 9, kind: input, shape index: {}]   ;;  %s1078_s10 = inlined_call_operand.vmem [shape: f32[1,32], index: 10, kind: input, shape index: {}]   ;;  %s1079_s11 = inlined_call_operand.vmem [shape: f32[1,32], index: 11, kind: input, shape index: {}]   ;;  %s1080_s12 = inlined_call_operand.vmem [shape: f32[1,64], index: 12, kind: input, shape index: {}]   ;;  %s1081_s13 = inlined_call_operand.<no memory space> [shape: f32[1], index: 13, kind: input, shape index: {}]   ;;  %s1082_s14 = inlined_call_operand.vmem [shape: f32[8,1], index: 14, kind: output, shape index: {}]  }
   0x1   :  { %21 = vsyncpa [#allocation6], 0 }
   0x2   :  { %22 = vsyncpa [#allocation9], 0 }
   0x3   :  { %23 = vsyncpa [#allocation12], 0  ;;  %s841_s29 = smov [#allocation5]   ;;  %s842_s15 = smov [#allocation8]  }
   0x4   :  { %s40_s30 = sshll.u32 %s841_s29, 4  ;;  %s62_s16 = sshll.u32 %s842_s15, 4  ;;  %s41_s30 = int_to_ptr.vmem [resolvable:$true] %s40_s30  ;;  %s63_s16 = int_to_ptr.vmem [resolvable:$true] %s62_s16 }
   0x5   :  { %s701_s19 = scalar_lea.hbm %s1069_s1, 128 }
   0x6   :  { %p702_p0 = scmp.ne.s32.totalorder %s1069_s1, %s701_s19  ;;  %p705_p1 = scmp.lt.u32.totalorder %s701_s19, %s1069_s1 }
   0x8   :  { %p707_p2 = pnand %p705_p1, %p702_p0 }
   0xa   :  { %710 = shalt.err (!%p707_p2)
}
   0xb   :  { %s711_s24 = scalar_lea.vmem %s41_s30, 128  ;;  %p716_p4 = scmp.lt.s32.totalorder %s41_s30, %s41_s30 }
   0xc   :  { %p712_p3 = scmp.ne.s32.totalorder %s41_s30, %s711_s24  ;;  %p717_p5 = scmp.lt.s32.totalorder %s711_s24, %s711_s24 }
   0xe   :  { %p718_p6 = por %p717_p5, %p716_p4 }
  0x10   :  { %p719_p7 = pnand %p718_p6, %p712_p3 }
  0x12   :  { %722 = shalt.err (!%p719_p7)
}
  0x13   :  { %43 = dma.hbm_to_vmem [thread:$0]  %s1069_s1, 128, %s41_s30, [#allocation6]  }
  0x14   :  { %s723_s29 = scalar_lea.hbm %s1071_s3, 128 }
  0x15   :  { %p724_p8 = scmp.ne.s32.totalorder %s1071_s3, %s723_s29  ;;  %p727_p9 = scmp.lt.u32.totalorder %s723_s29, %s1071_s3 }
  0x17   :  { %p729_p10 = pnand %p727_p9, %p724_p8 }
  0x19   :  { %732 = shalt.err (!%p729_p10)
}
  0x1a   :  { %s733_s20 = scalar_lea.vmem %s63_s16, 128  ;;  %p738_p12 = scmp.lt.s32.totalorder %s63_s16, %s63_s16 }
  0x1b   :  { %p734_p11 = scmp.ne.s32.totalorder %s63_s16, %s733_s20  ;;  %p739_p13 = scmp.lt.s32.totalorder %s733_s20, %s733_s20 }
  0x1d   :  { %p740_p0 = por %p739_p13, %p738_p12 }
  0x1f   :  { %p741_p1 = pnand %p740_p0, %p734_p11 }
  0x21   :  { %744 = shalt.err (!%p741_p1)
}
  0x22   :  { %65 = dma.hbm_to_vmem [thread:$0]  %s1071_s3, 128, %s63_s16, [#allocation9]  }
  0x23   :  { %s843_s21 = smov [#allocation3]   ;;  %s844_s23 = smov [#allocation7]  }
  0x24   :  { %s30_s22 = sshll.u32 %s843_s21, 4  ;;  %s49_s24 = sshll.u32 %s844_s23, 4  ;;  %s31_s22 = int_to_ptr.vmem [resolvable:$true] %s30_s22  ;;  %s951_s24 = int_to_ptr.vmem [resolvable:$true] %s49_s24 }
  0x25   :  { %s745_s27 = scalar_lea.hbm %s1068_s0, 128 }
  0x26   :  { %p746_p2 = scmp.ne.s32.totalorder %s1068_s0, %s745_s27  ;;  %p749_p3 = scmp.lt.u32.totalorder %s745_s27, %s1068_s0 }
  0x28   :  { %p751_p4 = pnand %p749_p3, %p746_p2 }
  0x2a   :  { %754 = shalt.err (!%p751_p4)
}
  0x2b   :  { %s755_s3 = scalar_lea.vmem %s31_s22, 128  ;;  %p760_p6 = scmp.lt.s32.totalorder %s31_s22, %s31_s22 }
  0x2c   :  { %p756_p5 = scmp.ne.s32.totalorder %s31_s22, %s755_s3  ;;  %p761_p7 = scmp.lt.s32.totalorder %s755_s3, %s755_s3 }
  0x2e   :  { %p762_p8 = por %p761_p7, %p760_p6 }
  0x30   :  { %p763_p9 = pnand %p762_p8, %p756_p5 }
  0x32   :  { %766 = shalt.err (!%p763_p9)
}
  0x33   :  { %33 = dma.hbm_to_vmem [thread:$0]  %s1068_s0, 128, %s31_s22, [#allocation4]  }
  0x34   :  { %s767_s1 = scalar_lea.hbm %s1070_s2, 256 }
  0x35   :  { %p768_p10 = scmp.ne.s32.totalorder %s1070_s2, %s767_s1  ;;  %p771_p11 = scmp.lt.u32.totalorder %s767_s1, %s1070_s2 }
  0x37   :  { %p773_p12 = pnand %p771_p11, %p768_p10 }
  0x39   :  { %776 = shalt.err (!%p773_p12)
}
  0x3a   :  { %s777_s26 = scalar_lea.vmem %s951_s24, 256  ;;  %p782_p0 = scmp.lt.s32.totalorder %s951_s24, %s951_s24 }
  0x3b   :  { %p778_p13 = scmp.ne.s32.totalorder %s951_s24, %s777_s26  ;;  %p783_p1 = scmp.lt.s32.totalorder %s777_s26, %s777_s26 }
  0x3d   :  { %p784_p2 = por %p783_p1, %p782_p0 }
  0x3f   :  { %p785_p3 = pnand %p784_p2, %p778_p13 }
  0x41   :  { %788 = shalt.err (!%p785_p3)
}
  0x42   :  { %s845_s0 = smov 128   ;;  %s846_s22 = smov 8  }
  0x43   :  { %55 = dma.hbm_to_vmem [thread:$0]  %s1070_s2, 256, %s951_s24, [#allocation6], %s845_s0, %s845_s0, %s846_s22  }
  0x44   :  { %s847_s29 = smov [#allocation10]   ;;  %s848_s17 = smov [#allocation11]  }
  0x45   :  { %s73_s15 = sshll.u32 %s847_s29, 4  ;;  %s87_s3 = sshll.u32 %s848_s17, 4  ;;  %s74_s15 = int_to_ptr.vmem [resolvable:$true] %s73_s15  ;;  %s985_s3 = int_to_ptr.vmem [resolvable:$true] %s87_s3 }
  0x46   :  { %s789_s19 = scalar_lea.hbm %s1073_s5, 512 }
  0x47   :  { %p790_p4 = scmp.ne.s32.totalorder %s1073_s5, %s789_s19  ;;  %p793_p5 = scmp.lt.u32.totalorder %s789_s19, %s1073_s5 }
  0x49   :  { %p795_p6 = pnand %p793_p5, %p790_p4 }
  0x4b   :  { %798 = shalt.err (!%p795_p6)
}
  0x4c   :  { %s799_s2 = scalar_lea.vmem %s74_s15, 512  ;;  %p804_p8 = scmp.lt.s32.totalorder %s74_s15, %s74_s15 }
  0x4d   :  { %p800_p7 = scmp.ne.s32.totalorder %s74_s15, %s799_s2  ;;  %p805_p9 = scmp.lt.s32.totalorder %s799_s2, %s799_s2 }
  0x4f   :  { %p806_p10 = por %p805_p9, %p804_p8 }
  0x51   :  { %p807_p11 = pnand %p806_p10, %p800_p7 }
  0x53   :  { %810 = shalt.err (!%p807_p11)
}
  0x54   :  { %79 = dma.hbm_to_vmem [thread:$0]  %s1073_s5, 512, %s74_s15, [#allocation9], %s845_s0, %s845_s0, %s846_s22  }
  0x55   :  { %s811_s27 = scalar_lea.hbm %s1075_s7, 512 }
  0x56   :  { %p812_p12 = scmp.ne.s32.totalorder %s1075_s7, %s811_s27  ;;  %p815_p13 = scmp.lt.u32.totalorder %s811_s27, %s1075_s7 }
  0x58   :  { %p817_p0 = pnand %p815_p13, %p812_p12 }
  0x5a   :  { %820 = shalt.err (!%p817_p0)
}
  0x5b   :  { %s821_s18 = scalar_lea.vmem %s985_s3, 512  ;;  %p826_p2 = scmp.lt.s32.totalorder %s985_s3, %s985_s3 }
  0x5c   :  { %p822_p1 = scmp.ne.s32.totalorder %s985_s3, %s821_s18  ;;  %p827_p3 = scmp.lt.s32.totalorder %s821_s18, %s821_s18 }
  0x5e   :  { %p828_p4 = por %p827_p3, %p826_p2 }
  0x60   :  { %p829_p5 = pnand %p828_p4, %p822_p1 }
  0x62   :  { %832 = shalt.err (!%p829_p5)
}
  0x63   :  { %93 = dma.hbm_to_vmem [thread:$0]  %s1075_s7, 512, %s985_s3, [#allocation12], %s845_s0, %s845_s0, %s846_s22  }
  0x64   :  { %833 = dma.done.wait [#allocation4], 128  }
  0x65   :  { %834 = vsyncadd [#allocation4], 4294967168 }
  0x66   :  { %835 = dma.done.wait [#allocation6], 384  }
  0x67   :  { %836 = vsyncadd [#allocation6], 4294966912 }
  0x68   :  { %837 = dma.done.wait [#allocation9], 640  }
  0x69   :  { %838 = vsyncadd [#allocation9], 4294966656 }
  0x6a   :  { %839 = dma.done.wait [#allocation12], 512  }
  0x6b   :  { %840 = vsyncadd [#allocation12], 4294966784  ;;  %v849_v0 = vmov 0.0   ;;  %vm850_vm0 = vmmov 0   ;;  %v851_v1 = vmov 0.0|0.0   ;;  %vm129_vm1 = vcmask 64512  }
  0x6c   :  { %624 = vmatprep.subr.mxu1 %v849_v0  ;;  %626 = vmatprep.mubr.msk.f32.mxu1 %vm850_vm0, %v849_v0  ;;  %v128_v2 = vld [vmem:[#allocation8] sm:$0xff]  ;;  %v125_v3 = vld [vmem:[#allocation5] sm:$0xff]  ;;  %v126_v4 = vld [vmem:[#allocation7] sm:$0xff]  ;;  %vm203_vm2 = vcmask 130048   ;;  %vm301_vm3 = vcmask 261120   ;;  %vm575_vm4 = vcmask 523264  }
  0x6d   :  { %672 = vmatprep.subr.bf16.mxu0 %v851_v1  ;;  %644 = vmatprep.mubr.msk.f32.mxu0 %vm850_vm0, %v849_v0  ;;  %v127_v5 = vld [vmem:[#allocation7 + $0x8] sm:$0xff]  ;;  %v124_v7 = vld [vmem:[#allocation3] sm:$0xff]  ;;  %v290_v8 = vld [vmem:[#allocation10] sm:$0xff]  ;;  %vm583_vm5 = vcmask 7168  }
  0x6e   :  { %625 = vmatpush3.msra.mxu1 %v128_v2  ;;  %v670_v6 = vpack.c.bf16 %v127_v5, %v126_v4  ;;  %v291_v9 = vld [vmem:[#allocation10 + $0x8] sm:$0xff]  ;;  %v292_v11 = vld [vmem:[#allocation10 + $0x10] sm:$0xff]  ;;  %v293_v12 = vld [vmem:[#allocation10 + $0x18] sm:$0xff] }
  0x6f   :  { %627 = vmatmul.mubr.msk.f32.vlgmr.msra.gmra.mrb[0].mxu1 %vm129_vm1, %v125_v3  ;;  %669 = vmatprep.subr.bf16.mxu1 %v851_v1  ;;  %v673_v10 = vpack.c.bf16 %v291_v9, %v290_v8  ;;  %v676_v13 = vpack.c.bf16 %v293_v12, %v292_v11  ;;  %v595_v17 = vld [vmem:[%s1072_s4] ss:$0 sm:$0xff]  ;;  %v380_v24 = vld [vmem:[#allocation11] sm:$0xff]  ;;  %v381_v25 = vld [vmem:[#allocation11 + $0x8] sm:$0xff] }
  0x70   :  { %633 = vmatprep.mubr.msk.f32.mxu1 %vm850_vm0, %v849_v0  ;;  %671 = vmatpush3.bf16.msra.mxu1 %v670_v6  ;;  %v685_v27 = vpack.c.bf16 %v381_v25, %v380_v24  ;;  %v601_v28 = vld [vmem:[%s1078_s10] ss:$0 sm:$0xff]  ;;  %v382_v30 = vld [vmem:[#allocation11 + $0x10] sm:$0xff]  ;;  %v385_v36 = vld [vmem:[%s1076_s8 + $0x8] sm:$0xff] }
  0x71   :  { %678 = vmatprep.subr.bf16.mxu1 %v851_v1  ;;  %674 = vmatpush3.bf16.msra.mxu0 %v673_v10  ;;  %v383_v31 = vld [vmem:[#allocation11 + $0x18] sm:$0xff]  ;;  %v386_v38 = vld [vmem:[%s1076_s8 + $0x10] sm:$0xff]  ;;  %v387_v39 = vld [vmem:[%s1076_s8 + $0x18] sm:$0xff] }
  0x72   :  { %675 = vmatprep.subr.bf16.mxu0 %v851_v1  ;;  %v688_v33 = vpack.c.bf16 %v383_v31, %v382_v30  ;;  %v384_v35 = vld [vmem:[%s1076_s8] sm:$0xff]  ;;  %v682_v40 = vpack.c.bf16 %v387_v39, %v386_v38 }
  0x73   :  { %634 = vmatmul.mubr.msk.f32.vlgmr.msra.gmra.mrb[2].mxu1 %vm203_vm2, %v124_v7  ;;  %v679_v37 = vpack.c.bf16 %v385_v36, %v384_v35  ;;  %v596_v41 = vld [vmem:[%s1074_s6] ss:$0 sm:$0xff]  ;;  %v581_v7 = vstv %s1081_s13 }
  0x74   :  { %655 = vmatprep.mubr.msk.f32.mxu1 %vm850_vm0, %v849_v0  ;;  %v602_v51 = vld [vmem:[%s1079_s11] ss:$0 sm:$0xff] }
  0x75   :  { %677 = vmatpush3.bf16.msra.mxu0 %v676_v13  ;;  %680 = vmatpush3.bf16.msra.mxu1 %v679_v37  ;;  %v600_v56 = vld [vmem:[%s1077_s9] ss:$0 sm:$0xff] }
  0x76   :  { %684 = vmatprep.subr.bf16.mxu0 %v851_v1  ;;  %681 = vmatprep.subr.bf16.mxu1 %v851_v1 }
  0x79   :  { %683 = vmatpush3.bf16.msra.mxu1 %v682_v40 }
 0x142   :  { %v199_v14 = vpop.f32.mrb[0].mxu1 }
 0x143   :  { %v628_v15 = vpop.f32.mrb[1].mxu1 }
 0x146   :  { %v273_v16 = vpop.f32.mrb[2].mxu1 }
 0x147   :  { %v274_v18 = vadd.f32 %v273_v16, %v199_v14  ;;  %v635_v19 = vpop.f32.mrb[3].mxu1 }
 0x149   :  { %v284_v20 = vadd.f32 %v595_v17, %v274_v18 }
 0x14b   :  { %v285_v21 = vadd.f32 3.0, %v284_v20 }
 0x14d   :  { %v286_v22 = vmax.f32 %v285_v21, 0.0 }
 0x14f   :  { %v287_v23 = vmin.f32 %v286_v22, 6.0 }
 0x151   :  { %v288_v26 = vmul.f32 0.16666667, %v287_v23 }
 0x153   :  { %v289_v29 = vmul.f32 %v288_v26, %v284_v20 }
 0x155   :  { %645 = vmatmul.mubr.msk.f32.vlgmr.msra.gmra.mrb[0].mxu0 %vm301_vm3, %v289_v29  ;;  %v551_v32 = vmul.f32 %v601_v28, %v289_v29 }
 0x156   :  { %686 = vmatpush3.bf16.msra.mxu0 %v685_v27  ;;  %666 = vmatprep.mubr.msk.f32.mxu0 %vm850_vm0, %v849_v0  ;;  %v603_v0 = vld [vmem:[%s1080_s12] ss:$0 sm:$0xff] }
 0x157   :  { %v552_v34 = vsel %vm301_vm3, %v551_v32, 0.0  ;;  %687 = vmatprep.subr.bf16.mxu0 %v851_v1 }
 0x158   :  { %553 = vadd.xlane.f32.xlu0 %v552_v34 }
 0x15a   :  { %689 = vmatpush3.bf16.msra.mxu0 %v688_v33 }
 0x15d   :  { %667 = vmatmul.mubr.msk.f32.vlgmr.msra.gmra.mrb[2].mxu0 %vm301_vm3, %v289_v29 }
 0x1e5   :  { %v554_v4 = vpop.xlane.xlu0 %553 }
 0x228   :  { %v371_v42 = vpop.f32.mrb[0].mxu0 }
 0x229   :  { %v372_v43 = vadd.f32 %v596_v41, %v371_v42  ;;  %v646_v44 = vpop.f32.mrb[1].mxu0 }
 0x22b   :  { %v375_v45 = vadd.f32 3.0, %v372_v43 }
 0x22d   :  { %v376_v46 = vmax.f32 %v375_v45, 0.0 }
 0x22f   :  { %v377_v47 = vmin.f32 %v376_v46, 6.0 }
 0x230   :  { %v527_v48 = vpop.f32.mrb[2].mxu0 }
 0x231   :  { %v378_v49 = vmul.f32 0.16666667, %v377_v47  ;;  %v668_v50 = vpop.f32.mrb[3].mxu0 }
 0x233   :  { %v379_v52 = vmul.f32 %v378_v49, %v372_v43 }
 0x235   :  { %656 = vmatmul.mubr.msk.f32.vlgmr.msra.gmra.mrb[4].mxu1 %vm301_vm3, %v379_v52  ;;  %v562_v53 = vmul.f32 %v602_v51, %v379_v52 }
 0x237   :  { %v563_v54 = vsel %vm301_vm3, %v562_v53, 0.0 }
 0x238   :  { %564 = vadd.xlane.f32.xlu0 %v563_v54 }
 0x2c5   :  { %v565_v5 = vpop.xlane.xlu0 %564 }
 0x2c6   :  { %v566_v6 = vadd.f32 %v565_v5, %v554_v4 }
 0x308   :  { %v457_v55 = vpop.f32.mrb[4].mxu1 }
 0x309   :  { %v528_v57 = vadd.f32 %v527_v48, %v457_v55  ;;  %v657_v58 = vpop.f32.mrb[5].mxu1 }
 0x30b   :  { %v538_v59 = vadd.f32 %v600_v56, %v528_v57 }
 0x30d   :  { %v539_v60 = vadd.f32 3.0, %v538_v59 }
 0x30f   :  { %v540_v61 = vmax.f32 %v539_v60, 0.0 }
 0x311   :  { %v541_v62 = vmin.f32 %v540_v61, 6.0 }
 0x313   :  { %v542_v63 = vmul.f32 0.16666667, %v541_v62 }
 0x315   :  { %v543_v1 = vmul.f32 %v542_v63, %v538_v59 }
 0x317   :  { %v574_v2 = vmul.f32 %v603_v0, %v543_v1 }
 0x319   :  { %v576_v3 = vsel %vm575_vm4, %v574_v2, 0.0 }
 0x31a   :  { %577 = vadd.xlane.f32.xlu1 %v576_v3 }
 0x3a7   :  { %v578_v8 = vpop.xlane.xlu1 %577 }
 0x3a8   :  { %v579_v9 = vadd.f32 %v578_v8, %v566_v6 }
 0x3aa   :  { %v582_v10 = vadd.f32 %v581_v7, %v579_v9 }
 0x3ac   :  { %584 = vst.msk [vmem:[%s1082_s14] sm:$0xff] %vm583_vm5, %v582_v10 }
 0x3ad   :  { %589 = vsyncpa [#allocation4], 1 }
 0x3ae   :  { %590 = vsyncpa [#allocation6], 1 }
 0x3af   :  { %591 = vsyncpa [#allocation9], 1 }
 0x3b0   :  { %592 = vsyncpa [#allocation12], 1 }

</bundles_post_ra>
